<compile_context>
chip_gen: v6e
topology: v6e:2x2x1
jax: 0.10.0
libtpu: 0.0.40
codegen_flags: <defaults>
</compile_context>

<pallas_src>
import functools

import jax
import jax.numpy as jnp
from jax.experimental import pallas as pl
from jax.experimental.pallas import tpu as pltpu


def _ce_kernel(tgt_ref, x_ref, out_ref, acc_ref, *, tl, total_l, need_mask):
    # tgt_ref : SMEM (N,) int32 scalar-prefetched targets
    # x_ref   : VMEM (C, TL) block for sample n, spatial tile l (native dtype)
    # out_ref : VMEM (1, 1, 1) f32 per-sample partial (resident across the l axis)
    # acc_ref : VMEM (1, TL) f32 lane-dense accumulator scratch
    n = pl.program_id(0)
    l = pl.program_id(1)

    x = x_ref[...].astype(jnp.float32)                         # (C, TL)
    m = jnp.max(x, axis=0, keepdims=True)                      # (1, TL) sublane reduce
    s = jnp.sum(jnp.exp(x - m), axis=0, keepdims=True)         # (1, TL) sublane reduce
    lse = m + jnp.log(s)                                       # (1, TL)

    tgt = tgt_ref[n]                                           # scalar class index
    x_t = x_ref[pl.ds(tgt, 1), :].astype(jnp.float32)          # (1, TL) target row only

    loss_lane = lse - x_t                                      # (1, TL) = -log p[tgt]

    if need_mask:
        gl = l * tl + jax.lax.broadcasted_iota(jnp.int32, loss_lane.shape, 1)
        loss_lane = jnp.where(gl < total_l, loss_lane, 0.0)

    # Initialize-by-value on the first tile (skips a zero-fill + read-add pass).
    @pl.when(l == 0)
    def _():
        acc_ref[...] = loss_lane

    @pl.when(l > 0)
    def _():
        acc_ref[...] += loss_lane

    @pl.when(l == pl.num_programs(1) - 1)
    def _():
        total = jnp.sum(acc_ref[...], axis=1, keepdims=True)   # (1, 1): one lane reduce / sample
        out_ref[...] = total.reshape(1, 1, 1)


def _choose_tile_l(C, L, itemsize):
    """Largest lane tile (multiple of 128) keeping one input buffer ~<=2 MiB."""
    if L < 128:
        return L                     # full (un-tiled) last dim; no (8,128) issue
    budget_bytes = 2 * 1024 * 1024   # per buffer; x2 for double buffering -> ~4 MiB
    tl = budget_bytes // max(C * itemsize, 1)
    tl = max(128, min(2048, (tl // 128) * 128))
    tl = min(tl, (L // 128) * 128)   # never exceed the array extent
    return tl


def cross_entropy_loss(inputs, targets):
    """inputs: (N, C, *spatial) float; targets: (N,) int. Returns scalar f32 loss."""
    N, C = inputs.shape[0], inputs.shape[1]
    x = inputs.reshape(N, C, -1)                 # (N, C, L), native dtype (no upcast pass)
    L = x.shape[2]
    targets = targets.astype(jnp.int32)

    tl = _choose_tile_l(C, L, x.dtype.itemsize)
    num_l = pl.cdiv(L, tl)
    need_mask = (L % tl) != 0

    kernel = functools.partial(_ce_kernel, tl=tl, total_l=L, need_mask=need_mask)

    cost = pl.CostEstimate(
        flops=int(5 * N * C * L),                    # sub/max/sum/accumulate (rough)
        transcendentals=int(N * C * L + N * L),      # exp per element + log per lane
        bytes_accessed=int(N * C * L * x.dtype.itemsize + N * 4 + N * 4),
    )

    partials = pl.pallas_call(
        kernel,
        out_shape=jax.ShapeDtypeStruct((N, 1, 1), jnp.float32),
        grid_spec=pltpu.PrefetchScalarGridSpec(
            num_scalar_prefetch=1,
            grid=(N, num_l),
            in_specs=[pl.BlockSpec((None, C, tl), lambda n, l, tgt: (n, 0, l))],
            out_specs=pl.BlockSpec((1, 1, 1), lambda n, l, tgt: (n, 0, 0)),
            scratch_shapes=[pltpu.VMEM((1, tl), jnp.float32)],
        ),
        compiler_params=pltpu.CompilerParams(
            dimension_semantics=("parallel", "arbitrary")),
        cost_estimate=cost,
    )(targets, x)

    # Tiny final reduction + normalization in plain JAX.
    return jnp.sum(partials) / jnp.float32(N * L)


if __name__ == "__main__":
    key = jax.random.PRNGKey(0)
    k1, k2 = jax.random.split(key)

    N, C, H, W = 2, 4, 16, 16
    inputs = jax.random.normal(k1, (N, C, H, W), dtype=jnp.float32)
    targets = jax.random.randint(k2, (N,), 0, C, dtype=jnp.int32)

    loss = cross_entropy_loss(inputs, targets)
    jax.block_until_ready(loss)

    # Pure-JAX reference matching the PyTorch module's semantics.
    x_flat = inputs.reshape(N, C, -1)
    lp = jax.nn.log_softmax(x_flat, axis=1)
    onehot = jax.nn.one_hot(targets, C, dtype=jnp.float32)[:, :, None]
    ref = jnp.sum(jnp.mean(-onehot * lp, axis=0)) / x_flat.shape[2]
    assert jnp.allclose(loss, ref, rtol=1e-5, atol=1e-6), (loss, ref)

    # TODO(synk): PyTorch's general CrossEntropyLoss accepts (N, H, W) targets; this
    # module broadcasts one class per sample over all spatial positions, as specced.
    print("KERNEL_OK")
</pallas_src>

<mosaic_0001>
module attributes {stable_mosaic.version = 11 : i64} {
  func.func @_ce_kernel(%arg0: i32, %arg1: i32, %arg2: memref<2xi32, #tpu.memory_space<smem>>, %arg3: memref<1x4x256xf32, #tpu.memory_space<vmem>>, %arg4: memref<1x1x1xf32, #tpu.memory_space<vmem>>, %arg5: memref<1x256xf32, #tpu.memory_space<vmem>>) attributes {dimension_semantics = [#tpu.dimension_semantics<parallel>, #tpu.dimension_semantics<arbitrary>], iteration_bounds = array<i64: 2, 1>, scalar_prefetch = 1 : i64, scratch_operands = 1 : i64, tpu.core_type = #tpu.core_type<tc>, window_params = [{transform_indices = @transform_0, window_bounds = array<i64: 1, 4, 256>}, {transform_indices = @transform_1, window_bounds = array<i64: 1, 1, 1>}]} {
    %c0 = arith.constant 0 : index
    %c0_0 = arith.constant 0 : index
    %c0_1 = arith.constant 0 : index
    %0 = vector.load %arg3[%c0, %c0_0, %c0_1] : memref<1x4x256xf32, #tpu.memory_space<vmem>>, vector<1x4x256xf32>
    %1 = vector.shape_cast %0 : vector<1x4x256xf32> to vector<4x256xf32>
    %cst = arith.constant dense<0xFF800000> : vector<256xf32>
    %2 = vector.multi_reduction <maximumf>, %1, %cst [0] : vector<4x256xf32> to vector<256xf32>
    %3 = vector.shape_cast %2 : vector<256xf32> to vector<1x256xf32>
    %4 = vector.broadcast %3 : vector<1x256xf32> to vector<4x256xf32>
    %5 = arith.subf %1, %4 : vector<4x256xf32>
    %6 = math.exp %5 : vector<4x256xf32>
    %cst_2 = arith.constant dense<0.000000e+00> : vector<256xf32>
    %7 = vector.multi_reduction <add>, %6, %cst_2 [0] : vector<4x256xf32> to vector<256xf32>
    %8 = vector.shape_cast %7 : vector<256xf32> to vector<1x256xf32>
    %9 = math.log %8 : vector<1x256xf32>
    %10 = arith.addf %3, %9 : vector<1x256xf32>
    %11 = arith.index_cast %arg0 : i32 to index
    %12 = memref.load %arg2[%11] : memref<2xi32, #tpu.memory_space<smem>>
    %c0_3 = arith.constant 0 : index
    %13 = arith.index_cast %12 : i32 to index
    %c0_4 = arith.constant 0 : index
    %14 = vector.load %arg3[%c0_3, %13, %c0_4] : memref<1x4x256xf32, #tpu.memory_space<vmem>>, vector<1x1x256xf32>
    %15 = vector.shape_cast %14 : vector<1x1x256xf32> to vector<1x256xf32>
    %16 = arith.subf %10, %15 : vector<1x256xf32>
    %c0_i32 = arith.constant 0 : i32
    %17 = arith.cmpi eq, %arg1, %c0_i32 : i32
    %18 = arith.extui %17 : i1 to i32
    %c0_i32_5 = arith.constant 0 : i32
    %19 = arith.cmpi ne, %18, %c0_i32_5 : i32
    scf.if %19 {
      %c0_10 = arith.constant 0 : index
      %c0_11 = arith.constant 0 : index
      %26 = vector.load %arg5[%c0_10, %c0_11] : memref<1x256xf32, #tpu.memory_space<vmem>>, vector<1x256xf32>
      tpu.vector_store %arg5[%c0_10, %c0_11], %16 {strides = array<i32>} : memref<1x256xf32, #tpu.memory_space<vmem>>, vector<1x256xf32>,
    } else {
    }
    %c0_i32_6 = arith.constant 0 : i32
    %20 = arith.cmpi sgt, %arg1, %c0_i32_6 : i32
    %21 = arith.extui %20 : i1 to i32
    %c0_i32_7 = arith.constant 0 : i32
    %22 = arith.cmpi ne, %21, %c0_i32_7 : i32
    scf.if %22 {
      %c0_10 = arith.constant 0 : index
      %c0_11 = arith.constant 0 : index
      %26 = vector.load %arg5[%c0_10, %c0_11] : memref<1x256xf32, #tpu.memory_space<vmem>>, vector<1x256xf32>
      %27 = arith.addf %26, %16 : vector<1x256xf32>
      %c0_12 = arith.constant 0 : index
      %c0_13 = arith.constant 0 : index
      %28 = vector.load %arg5[%c0_12, %c0_13] : memref<1x256xf32, #tpu.memory_space<vmem>>, vector<1x256xf32>
      tpu.vector_store %arg5[%c0_12, %c0_13], %27 {strides = array<i32>} : memref<1x256xf32, #tpu.memory_space<vmem>>, vector<1x256xf32>,
    } else {
    }
    %c0_i32_8 = arith.constant 0 : i32
    %23 = arith.cmpi eq, %arg1, %c0_i32_8 : i32
    %24 = arith.extui %23 : i1 to i32
    %c0_i32_9 = arith.constant 0 : i32
    %25 = arith.cmpi ne, %24, %c0_i32_9 : i32
    scf.if %25 {
      %c0_10 = arith.constant 0 : index
      %c0_11 = arith.constant 0 : index
      %26 = vector.load %arg5[%c0_10, %c0_11] : memref<1x256xf32, #tpu.memory_space<vmem>>, vector<1x256xf32>
      %cst_12 = arith.constant dense<0.000000e+00> : vector<1xf32>
      %27 = vector.multi_reduction <add>, %26, %cst_12 [1] : vector<1x256xf32> to vector<1xf32>
      %28 = vector.shape_cast %27 : vector<1xf32> to vector<1x1xf32>
      %29 = vector.shape_cast %28 : vector<1x1xf32> to vector<1x1x1xf32>
      %c0_13 = arith.constant 0 : index
      %c0_14 = arith.constant 0 : index
      %c0_15 = arith.constant 0 : index
      %30 = vector.load %arg4[%c0_13, %c0_14, %c0_15] : memref<1x1x1xf32, #tpu.memory_space<vmem>>, vector<1x1x1xf32>
      tpu.vector_store %arg4[%c0_13, %c0_14, %c0_15], %29 {strides = array<i32>} : memref<1x1x1xf32, #tpu.memory_space<vmem>>, vector<1x1x1xf32>,
    } else {
    }
    return
  }
  func.func @transform_0(%arg0: i32, %arg1: i32, %arg2: memref<2xi32, #tpu.memory_space<smem>>) -> (i32, i32, i32) {
    %c0_i32 = arith.constant 0 : i32
    %c0_i32_0 = arith.constant 0 : i32
    return %arg0, %c0_i32, %arg1 : i32, i32, i32
  }
  func.func @transform_1(%arg0: i32, %arg1: i32, %arg2: memref<2xi32, #tpu.memory_space<smem>>) -> (i32, i32, i32) {
    %c0_i32 = arith.constant 0 : i32
    %c0_i32_0 = arith.constant 0 : i32
    %c0_i32_1 = arith.constant 0 : i32
    return %arg0, %c0_i32, %c0_i32_0 : i32, i32, i32
  }
}

</mosaic_0001>

<bundles_post_ra>
// kernel: tpu_custom_call.1
= control target key start
LH: loop header
LB: loop body
LE: loop exit
PB: predicated region body
PF: predicated region fallthrough
CT: control target
= control target key end

     0   :  { %s546_s9 = smov [#allocation4]   ;;  %s679_s0 = inlined_call_operand.hbm [shape: s32[2], index: 0, kind: input, shape index: {}]   ;;  %s680_s1 = inlined_call_operand.hbm [shape: f32[2,4,256], index: 1, kind: input, shape index: {}]   ;;  %s681_s2 = inlined_call_operand.vmem [shape: f32[2,1,1], index: 2, kind: output, shape index: {}]  }
   0x1   :  { %8 = dma.hbm_to_smem %s679_s0, 16, %s546_s9, [#allocation3] }
   0x2   :  { %516 = dma.done.wait [#allocation3], 16 }
   0x3   :  { %517 = vsyncadd [#allocation3], 4294967280 }
   0x4   :  { %10 = sfence }
   0x5   :  { %11 = vsyncpa [#allocation6], 0 }
   0x6   :  { %13 = vsyncpa [#allocation6 + $0x1], 0  ;;  %s567_s12 = smov 0   ;;  %s569_s13 = smov 0  }
   0x7   :  { %s571_s14 = smov 0   ;;  %s573_s15 = smov 0  }
   0x8   :  { %s575_s16 = smov 0   ;;  %s577_s17 = smov 0  }
   0x9 LB: > { %s377_s0 = sadd.s32 4294967295, %s544_s17   ;;  %s31_s18 = sadd.s32 1, %s540_s16  ;;  %s544_s17 = sphi %s577_s17, %s19_s17   ;;  %s540_s16 = sphi %s575_s16, %s689_s16   ;;  %s536_s15 = sphi %s573_s15, %s688_s15   ;;  %s532_s14 = sphi %s571_s14, %s687_s14   ;;  %s528_s13 = sphi %s569_s13, %s686_s13   ;;  %s524_s12 = sphi %s567_s12, %s685_s12  }
   0xa   : > { %p33_p0 = scmp.ge.s32.totalorder %s31_s18, 2  ;;  %s40_s19 = sadd.s32 1, %s532_s14 }
   0xb   : > { %p47_p1 = scmp.ne.s32.totalorder %s532_s14, %s528_s13  ;;  %p48_p2 = scmp.eq.s32.totalorder %s544_s17, 0 }
   0xc   : > { %s691_s18 = smov (%p33_p0, %s31_s18), 0  ;;  %p53_p4 = scmp.ne.s32.totalorder %s528_s13, %s524_s12 }
   0xd   : > { %p603_p3 = por %p48_p2, %p47_p1  ;;  %s35_s21 = ssub.s32 %s540_s16, %s691_s18 }
   0xe   : > { %p54_p5 = scmp.eq.s32.totalorder %s377_s0, 0  ;;  %p38_p6 = scmp.eq.s32.totalorder %s35_s21, 0 }
   0xf   : > { %p398_p8 = scmp.lt.s32.totalorder %s544_s17, 2  ;;  %s103_s24 = sand.u32 1, %s532_s14  }
  0x10   : > { %p610_p7 = por %p54_p5, %p53_p4  ;;  %s390_s25 = sshll.u32 %s540_s16, 7 }
  0x11   : > { %s616_s23 = scalar_select %p38_p6, %s532_s14, %s40_s19  }
  0x12   : > { %s381_s26 = sshll.u32 %s103_s24, 3  ;;  %s115_s29 = scalar_lea.hbm %s680_s1, %s390_s25 }
  0x13   : > { %s107_s30 = scalar_lea.vmem [#allocation5], %s381_s26  ;;  %p625_p9 = pnand %p398_p8, %p603_p3 }
  0x14   : > { %s117_s3 = sshll.u32 %s107_s30, 4  ;;  %p384_p10 = scmp.ge.s32.totalorder %s544_s17, 1  ;;  %s118_s3 = int_to_ptr.vmem [resolvable:$true] %s117_s3 }
  0x15   : > { %p122_p11 = scmp.lt.s32.totalorder %s544_s17, 3  ;;  %s104_s5 = scalar_lea.sflag [#allocation6], %s103_s24 }
  0x16   : > { %p466_p12 = pneg %p625_p9  ;;  %s477_s6 = scalar_lea.vmem %s118_s3, 128 }
  0x17   : > { %p478_p13 = scmp.ne.s32.totalorder %s118_s3, %s477_s6  ;;  %s547_s7 = smov [#allocation5]  }
  0x18   : > { %s482_s8 = sshll.u32 %s547_s7, 4  ;;  %s483_s8 = int_to_ptr.vmem [resolvable:$false] %s482_s8 }
  0x19   : > { %p480_p0 = pnand %p478_p13, %p466_p12  ;;  %s484_s9 = scalar_lea.vmem %s483_s8, 256 }
  0x1a   : > { %p485_p2 = scmp.lt.s32.totalorder %s118_s3, %s483_s8  ;;  %p486_p3 = scmp.lt.s32.totalorder %s484_s9, %s477_s6 }
  0x1b   : > { %p481_p1 = pneg %p480_p0 }
  0x1c   : > { %p487_p4 = por %p486_p3, %p485_p2 }
  0x1e   : > { %p488_p5 = pnand %p487_p4, %p481_p1 }
  0x20   : > { %491 = shalt.err (!%p488_p5)
}
  0x21   : > { %397 = dma.hbm_to_vmem [thread:$0]  (!%p625_p9), %s115_s29, 128, %s118_s3, %s104_s5  }
  0x22   : > { %p123_p6 = pnand %p384_p10, %p122_p11 }
  0x23   : > { %s128_s10 = sand.u32 (!%p123_p6), 1, %s528_s13  }
  0x24   : > { %126 = sbr.rel (%p123_p6) target bundleno = 271 (0x10f), region = 24  ;;  %s640_s11 = sshll.u32 (!%p123_p6), %s128_s10, 3 }
  0x25   : > { %s129_s12 = scalar_lea.sflag (!%p123_p6), [#allocation6], %s128_s10  ;;  %s132_s0 = scalar_lea.vmem (!%p123_p6), [#allocation5], %s640_s11 }
  0x29   : > { %519 = dma.done.wait (%p610_p7), %s129_s12, 128  }
  0x2a   : > { %521 = vsyncadd (%p610_p7), %s129_s12, 4294967168  ;;  %vm157_vm0 = vcmask 1043456   ;;  %v153_v0 = vld [vmem:[%s132_s0] sm:$0xff]  ;;  %s202_s19 = sld [smem:[#allocation4 + %s536_s15]]  ;;  %v213_v35 = vlaneseq  ;;  %v548_v40 = vmov 1966171168  }
  0x2b   : > { %v155_v1 = vcombine.high %v153_v0, %v153_v0  ;;  %v158_v2 = vsel %vm157_vm0, %v153_v0, -inf  ;;  %v233_v41 = vunpack.c.l.s4 %v548_v40  ;;  %vm296_vm2 = vcmask 1040384   ;;  %p150_p7 = scmp.lt.s32.totalorder %s536_s15, 1 }
  0x2c   : > { %v159_v3 = vrot.slane %v158_v2, 4  ;;  %v214_v36 = vshrl.u32 %v213_v35, 7  ;;  %vm249_vm1 = vcmp.lt.s32.totalorder %v213_v35, 256  ;;  %vm302_vm3 = vcmask 0  }
  0x2d   : > { %v165_v4 = vsel %vm157_vm0, %v155_v1, -inf  ;;  %v234_v49 = vunpack.c.0.s8 %v233_v41  ;;  %s693_s15 = smov (!%p150_p7, %s536_s15), 1 }
  0x2e   : > { %v160_v5 = vmax.f32 %v158_v2, %v159_v3  ;;  %v166_v6 = vrot.slane %v165_v4, 4  ;;  %v215_v37 = vsub.s32 0, %v214_v36  ;;  %v219_v39 = vsub.s32 1, %v214_v36  ;;  %s152_s28 = scalar_lea.vmem %s681_s2, %s693_s15 }
  0x2f   : > { %v237_v53 = vsub.s32 %v234_v49, %v214_v36 }
  0x30   : > { %v161_v7 = vrot.slane %v160_v5, 2  ;;  %v167_v8 = vmax.f32 %v165_v4, %v166_v6  ;;  %s203_s20 = sshra.s32 %s202_s19, 2  ;;  %s206_s21 = sand.u32 3, %s202_s19 }
  0x31   : > { %s391_s22 = sshll.u32 %s203_s20, 3 }
  0x32   : > { %v162_v9 = vmax.f32 %v160_v5, %v161_v7  ;;  %v168_v10 = vrot.slane %v167_v8, 2  ;;  %s209_s24 = sadd.s32 %s391_s22, %s206_s21 }
  0x33   : > { %s210_s25 = scalar_lea.vmem %s132_s0, %s209_s24 [#allocation5] }
  0x34   : > { %v163_v11 = vrot.slane %v162_v9, 1  ;;  %v169_v12 = vmax.f32 %v167_v8, %v168_v10  ;;  %v211_v38 = vld [vmem:[%s210_s25] ss:$4 sm:$0x3] }
  0x35   : > { %v216_v44 = vrot.slane %v211_v38, %v215_v37  ;;  %v220_v48 = vrot.slane %v211_v38, %v219_v39 }
  0x36   : > { %v164_v13 = vmax.f32 %v162_v9, %v163_v11  ;;  %v170_v14 = vrot.slane %v169_v12, 1 }
  0x38   : > { %v171_v15 = vmax.f32 %v169_v12, %v170_v14 }
  0x3a   : > { %v174_v16 = vcombine.low %v164_v13, %v171_v15 }
  0x3c   : > { %v176_v17 = vsub.f32 %v153_v0, %v174_v16 }
  0x3e   : > { %v177_v18 = vmul.f32 1.442695, %v176_v17 }
  0x40   : > { %450 = vpow2.f32 %v177_v18 }
  0x4d   : > { %v451_v19 = vpop.eup %450 }
  0x4e   : > { %v180_v20 = vcombine.high %v451_v19, %v451_v19  ;;  %v182_v21 = vsel %vm157_vm0, %v451_v19, 0.0 }
  0x4f   : > { %v183_v22 = vrot.slane %v182_v21, 4 }
  0x50   : > { %v189_v23 = vsel %vm157_vm0, %v180_v20, 0.0 }
  0x51   : > { %v184_v24 = vadd.f32 %v183_v22, %v182_v21  ;;  %v190_v25 = vrot.slane %v189_v23, 4 }
  0x53   : > { %v185_v26 = vrot.slane %v184_v24, 2  ;;  %v191_v27 = vadd.f32 %v190_v25, %v189_v23 }
  0x55   : > { %v186_v28 = vadd.f32 %v185_v26, %v184_v24  ;;  %v192_v29 = vrot.slane %v191_v27, 2 }
  0x57   : > { %v187_v30 = vrot.slane %v186_v28, 1  ;;  %v193_v31 = vadd.f32 %v192_v29, %v191_v27 }
  0x59   : > { %v188_v32 = vadd.f32 %v187_v30, %v186_v28  ;;  %v194_v33 = vrot.slane %v193_v31, 1 }
  0x5b   : > { %v195_v34 = vadd.f32 %v194_v33, %v193_v31  ;;  %452 = vlog2.f32 %v188_v32 }
  0x5d   : > { %454 = vlog2.f32 %v195_v34 }
  0x68   : > { %v453_v42 = vpop.eup %452 }
  0x69   : > { %v197_v43 = vmul.f32 0.6931472, %v453_v42 }
  0x6a   : > { %v455_v45 = vpop.eup %454 }
  0x6b   : > { %v199_v46 = vmul.f32 0.6931472, %v455_v45  ;;  %v200_v47 = vadd.f32 %v197_v43, %v164_v13 }
  0x6d   : > { %v201_v50 = vadd.f32 %v199_v46, %v171_v15  ;;  %v223_v51 = vsub.f32 %v200_v47, %v216_v44 }
  0x6f   : > { %v224_v52 = vsub.f32 %v201_v50, %v220_v48 }
  0x71   : > { %v231_v54 = vcombine.low %v223_v51, %v224_v52 }
  0x73   : > { %v238_v55 = vrot.slane %v231_v54, %v237_v53 }
  0x75   : > { %v245_v56 = vrot.slane %v238_v55, %v237_v53 }
  0x77   : > { %251 = vst.msk [vmem:[#allocation2] sm:$0x3] %vm249_vm1, %v245_v56 }
  0x7e   : > { %v284_v57 = vld [vmem:[#allocation2] sm:$0x3] }
  0x7f   : > { %v289_v58 = vrot.slane %v284_v57, %v215_v37  ;;  %v293_v59 = vrot.slane %v284_v57, %v219_v39 }
  0x81   : > { %v297_v60 = vsel %vm296_vm2, %v289_v58, 0.0  ;;  %v298_v61 = vsel %vm296_vm2, %v293_v59, 0.0 }
  0x82   : > { %v299_v62 = vadd.f32 %v298_v61, %v297_v60 }
  0x84   : > { %300 = vadd.xlane.f32.xlu0 %v299_v62 }
 0x10d   : > { %v301_v63 = vpop.xlane.xlu0 %300 }
 0x10e   : > { %303 = vst.msk [vmem:[%s152_s28] sm:$0x1] %vm302_vm3, %v301_v63 }
 0x10f PF: > { %s19_s17 = sadd.s32 1, %s544_s17   ;;  %s685_s12 = smov %s528_s13 }
 0x110   : > { %p16_p8 = scmp.ge.s32.totalorder %s19_s17, 4   ;;  %s686_s13 = smov %s532_s14 }
 0x111   : > { %s687_s14 = smov %s616_s23  ;;  %s688_s15 = smov %s540_s16 }
 0x112   : > { %s689_s16 = smov %s691_s18  ;;  %18 = sbr.rel (!%p16_p8) target bundleno = 9 (0x9), region = 77 }
 0x117   :  { %321 = vsyncpa [#allocation6], 1 }
 0x118   :  { %323 = vsyncpa [#allocation6 + $0x1], 1 }

</bundles_post_ra>
